<compile_context>
chip_gen: v7x
topology: tpu7x:2x2x1
jax: 0.10.0
libtpu: 0.0.40
codegen_flags: <defaults>
</compile_context>

<pallas_src>
import functools
import math

import jax
import jax.numpy as jnp
from jax.experimental import pallas as pl
from jax.experimental.pallas import tpu as pltpu


def _timestep_embedder_kernel(t_ref, w1c_ref, w1s_ref, b1_ref, w2_ref, b2_ref,
                              out_ref, *, log_freq_scale):
    # t_ref:   (Nt, 1)     f32   timesteps (one row tile)
    # w1c_ref: (half, H)   bf16  first Linear weight, rows hit by cos(args)
    # w1s_ref: (half, H)   bf16  first Linear weight, rows hit by sin(args)
    # b1_ref:  (1, H)      f32
    # w2_ref:  (H, H)      bf16
    # b2_ref:  (1, H)      f32
    # out_ref: (Nt, H)     f32
    nt = t_ref.shape[0]
    half = w1c_ref.shape[0]

    t = t_ref[...]                                              # (Nt, 1)

    # Frequencies generated on the fly (EUP exp over one small tile -- no HBM
    # input needed):  freqs[k] = exp(-log(max_period) * k / half)
    k = jax.lax.broadcasted_iota(jnp.int32, (nt, half), 1).astype(jnp.float32)
    freqs = jnp.exp(k * log_freq_scale)                         # (Nt, half)
    args = t * freqs                                            # (Nt, half)

    cos_a = jnp.cos(args).astype(w1c_ref.dtype)                 # bf16 MXU inputs
    sin_a = jnp.sin(args).astype(w1s_ref.dtype)

    # emb @ W1 without materializing concat([cos, sin]); two K=half dots,
    # f32 accumulation on the MXU.
    h = jnp.dot(cos_a, w1c_ref[...], preferred_element_type=jnp.float32)
    h = h + jnp.dot(sin_a, w1s_ref[...], preferred_element_type=jnp.float32)
    h = h + b1_ref[...]

    h = h * jax.nn.sigmoid(h)                                   # SiLU in f32 (v5e-safe)

    out = jnp.dot(h.astype(w2_ref.dtype), w2_ref[...],
                  preferred_element_type=jnp.float32)
    out_ref[...] = (out + b2_ref[...]).astype(out_ref.dtype)


def prepare_timestep_embedder_params(w1, b1, w2, b2, *,
                                     weight_dtype=jnp.bfloat16):
    """One-time (load-time) parameter preparation.

    Expects w1: (freq_dim, hidden), w2: (hidden, hidden) -- i.e. nn.Linear
    weights already transposed from PyTorch's (out, in) to (in, out).
    Weights are cast to bf16 for HBM/DMA savings; biases stay f32.
    If freq_dim is odd, the PyTorch reference zero-pads the last embedding
    column, so the corresponding last row of w1 is exactly droppable.
    """
    freq_dim, hidden = w1.shape
    half = freq_dim // 2
    return {
        "w1_cos": jnp.asarray(w1[:half], weight_dtype),
        "w1_sin": jnp.asarray(w1[half:2 * half], weight_dtype),
        "b1": jnp.asarray(b1, jnp.float32).reshape(1, hidden),
        "w2": jnp.asarray(w2, weight_dtype),
        "b2": jnp.asarray(b2, jnp.float32).reshape(1, hidden),
    }


def _round_up(x, m):
    return (x + m - 1) // m * m


@functools.partial(jax.jit, static_argnums=2)
def _timestep_embedder_jit(t, params, max_period):
    w1c, w1s = params["w1_cos"], params["w1_sin"]
    b1, w2, b2 = params["b1"], params["w2"], params["b2"]
    half, hidden = w1c.shape
    n = t.shape[0]

    # Row tiling: multiple of 8 sublanes, capped at 256 rows per tile so large
    # batches get a >1 "parallel" grid (megacore sharding on v7x).
    n_pad = _round_up(max(n, 1), 8)
    row_tile = min(n_pad, 256)
    n_pad = _round_up(n_pad, row_tile)
    grid = (n_pad // row_tile,)

    t2d = jnp.zeros((n_pad, 1), jnp.float32).at[:n, 0].set(
        t.astype(jnp.float32))

    kernel = functools.partial(
        _timestep_embedder_kernel,
        log_freq_scale=-math.log(max_period) / half)

    weight_bytes = ((w1c.size + w1s.size) * w1c.dtype.itemsize
                    + w2.size * w2.dtype.itemsize)
    bytes_accessed = int(weight_bytes + (b1.size + b2.size) * 4
                         + n_pad * 4 + n_pad * hidden * 4)
    flops = int(2 * n_pad * (2 * half * hidden + hidden * hidden))
    transcendentals = int(n_pad * (3 * half + hidden))   # exp, cos, sin, sigmoid

    out = pl.pallas_call(
        kernel,
        out_shape=jax.ShapeDtypeStruct((n_pad, hidden), jnp.float32),
        grid=grid,
        in_specs=[
            pl.BlockSpec((row_tile, 1), lambda i: (i, 0)),
            pl.BlockSpec((half, hidden), lambda i: (0, 0)),
            pl.BlockSpec((half, hidden), lambda i: (0, 0)),
            pl.BlockSpec((1, hidden), lambda i: (0, 0)),
            pl.BlockSpec((hidden, hidden), lambda i: (0, 0)),
            pl.BlockSpec((1, hidden), lambda i: (0, 0)),
        ],
        out_specs=pl.BlockSpec((row_tile, hidden), lambda i: (i, 0)),
        compiler_params=pltpu.CompilerParams(
            dimension_semantics=("parallel",)),
        cost_estimate=pl.CostEstimate(
            flops=flops,
            transcendentals=transcendentals,
            bytes_accessed=bytes_accessed),
    )(t2d, w1c, w1s, b1, w2, b2)
    return out[:n]


def timestep_embedder(t, params, *, max_period=10000.0):
    """t: (N,) float timesteps. Returns (N, hidden) f32 embeddings."""
    return _timestep_embedder_jit(t, params, float(max_period))


# ----------------------------- references -----------------------------------

def _reference_f32(t, w1, b1, w2, b2, max_period=10000.0):
    """Pure-JAX f32 reference mirroring the PyTorch module."""
    half = w1.shape[0] // 2
    freqs = jnp.exp(
        -math.log(max_period) * jnp.arange(half, dtype=jnp.float32) / half)
    args = t.astype(jnp.float32)[:, None] * freqs[None]
    emb = jnp.concatenate([jnp.cos(args), jnp.sin(args)], axis=-1)
    h = emb @ w1 + b1
    h = h * jax.nn.sigmoid(h)
    return h @ w2 + b2


def _reference_mirrored(t, params, max_period=10000.0):
    """Pure-JAX reference mirroring the kernel's bf16 storage / dot inputs."""
    w1c, w1s = params["w1_cos"], params["w1_sin"]
    b1, w2, b2 = params["b1"], params["w2"], params["b2"]
    half = w1c.shape[0]
    k = jnp.arange(half, dtype=jnp.float32)
    freqs = jnp.exp(k * (-math.log(max_period) / half))
    args = t.astype(jnp.float32)[:, None] * freqs[None]
    cos_a = jnp.cos(args).astype(w1c.dtype)
    sin_a = jnp.sin(args).astype(w1s.dtype)
    h = (jnp.dot(cos_a, w1c, preferred_element_type=jnp.float32)
         + jnp.dot(sin_a, w1s, preferred_element_type=jnp.float32) + b1)
    h = h * jax.nn.sigmoid(h)
    return jnp.dot(h.astype(w2.dtype), w2,
                   preferred_element_type=jnp.float32) + b2


if __name__ == "__main__":
    N = 8                      # batch of timesteps
    FREQ_DIM = 256             # frequency_embedding_size
    HIDDEN = 128               # hidden_size

    key = jax.random.PRNGKey(0)
    k_t, k_w1, k_b1, k_w2, k_b2 = jax.random.split(key, 5)

    # deterministic synthetic parameters, already in (in, out) layout
    t = jax.random.uniform(k_t, (N,), jnp.float32, 0.0, 1000.0)
    w1 = jax.random.normal(k_w1, (FREQ_DIM, HIDDEN), jnp.float32) * 0.02
    b1 = jax.random.normal(k_b1, (HIDDEN,), jnp.float32) * 0.02
    w2 = jax.random.normal(k_w2, (HIDDEN, HIDDEN), jnp.float32) * 0.02
    b2 = jax.random.normal(k_b2, (HIDDEN,), jnp.float32) * 0.02

    params = prepare_timestep_embedder_params(w1, b1, w2, b2)

    out = timestep_embedder(t, params)
    out = jax.block_until_ready(out)
    assert out.shape == (N, HIDDEN)

    # Tight check against a reference that mirrors the kernel's bf16 math.
    ref_tight = _reference_mirrored(t, params)
    assert jnp.allclose(out, ref_tight, atol=1e-3, rtol=1e-3), \
        "mismatch vs bf16-mirrored reference"

    # Looser semantic check against the pure-f32 PyTorch-equivalent math
    # (difference is only bf16 weight/activation rounding).
    ref_f32 = _reference_f32(t, w1, b1, w2, b2)
    assert jnp.allclose(out, ref_f32, atol=2e-3, rtol=2e-2), \
        "mismatch vs f32 reference"

    print("KERNEL_OK")
</pallas_src>

<mosaic_0001>
module attributes {stable_mosaic.version = 11 : i64} {
  func.func @_timestep_embedder_kernel(%arg0: i32, %arg1: memref<8x1xf32, #tpu.memory_space<vmem>>, %arg2: memref<128x128xbf16, #tpu.memory_space<vmem>>, %arg3: memref<128x128xbf16, #tpu.memory_space<vmem>>, %arg4: memref<1x128xf32, #tpu.memory_space<vmem>>, %arg5: memref<128x128xbf16, #tpu.memory_space<vmem>>, %arg6: memref<1x128xf32, #tpu.memory_space<vmem>>, %arg7: memref<8x128xf32, #tpu.memory_space<vmem>>) attributes {dimension_semantics = [#tpu.dimension_semantics<parallel>], iteration_bounds = array<i64: 1>, scalar_prefetch = 0 : i64, scratch_operands = 0 : i64, tpu.core_type = #tpu.core_type<tc>, window_params = [{transform_indices = @transform_0, window_bounds = array<i64: 8, 1>}, {pipeline_mode = #tpu.pipeline_mode<synchronous>, transform_indices = @transform_1, window_bounds = array<i64: 128, 128>}, {pipeline_mode = #tpu.pipeline_mode<synchronous>, transform_indices = @transform_2, window_bounds = array<i64: 128, 128>}, {pipeline_mode = #tpu.pipeline_mode<synchronous>, transform_indices = @transform_3, window_bounds = array<i64: 1, 128>}, {pipeline_mode = #tpu.pipeline_mode<synchronous>, transform_indices = @transform_4, window_bounds = array<i64: 128, 128>}, {pipeline_mode = #tpu.pipeline_mode<synchronous>, transform_indices = @transform_5, window_bounds = array<i64: 1, 128>}, {transform_indices = @transform_6, window_bounds = array<i64: 8, 128>}]} {
    %c0 = arith.constant 0 : index
    %c0_0 = arith.constant 0 : index
    %0 = vector.load %arg1[%c0, %c0_0] : memref<8x1xf32, #tpu.memory_space<vmem>>, vector<8x1xf32>
    %1 = tpu.iota {dimensions = array<i32: 1>} : vector<8x128xi32>
    %2 = arith.sitofp %1 : vector<8x128xi32> to vector<8x128xf32>
    %cst = arith.constant -0.0719557852 : f32
    %3 = vector.broadcast %cst : f32 to vector<8x128xf32>
    %4 = arith.mulf %2, %3 : vector<8x128xf32>
    %5 = math.exp %4 : vector<8x128xf32>
    %6 = vector.broadcast %0 : vector<8x1xf32> to vector<8x128xf32>
    %7 = arith.mulf %6, %5 : vector<8x128xf32>
    %8 = math.cos %7 : vector<8x128xf32>
    %9 = arith.truncf %8 : vector<8x128xf32> to vector<8x128xbf16>
    %10 = math.sin %7 : vector<8x128xf32>
    %11 = arith.truncf %10 : vector<8x128xf32> to vector<8x128xbf16>
    %c0_1 = arith.constant 0 : index
    %c0_2 = arith.constant 0 : index
    %12 = vector.load %arg2[%c0_1, %c0_2] : memref<128x128xbf16, #tpu.memory_space<vmem>>, vector<128x128xbf16>
    %cst_3 = arith.constant dense<0.000000e+00> : vector<8x128xf32>
    %13 = tpu.matmul %9, %12, %cst_3 {dimension_numbers = #tpu.dot_dimension_numbers<[1], [0], [0], [1], [0, 0, 1, 1], [], []>} : vector<8x128xbf16>, vector<128x128xbf16>, vector<8x128xf32> -> vector<8x128xf32>
    %c0_4 = arith.constant 0 : index
    %c0_5 = arith.constant 0 : index
    %14 = vector.load %arg3[%c0_4, %c0_5] : memref<128x128xbf16, #tpu.memory_space<vmem>>, vector<128x128xbf16>
    %cst_6 = arith.constant dense<0.000000e+00> : vector<8x128xf32>
    %15 = tpu.matmul %11, %14, %cst_6 {dimension_numbers = #tpu.dot_dimension_numbers<[1], [0], [0], [1], [0, 0, 1, 1], [], []>} : vector<8x128xbf16>, vector<128x128xbf16>, vector<8x128xf32> -> vector<8x128xf32>
    %16 = arith.addf %13, %15 : vector<8x128xf32>
    %c0_7 = arith.constant 0 : index
    %c0_8 = arith.constant 0 : index
    %17 = vector.load %arg4[%c0_7, %c0_8] : memref<1x128xf32, #tpu.memory_space<vmem>>, vector<1x128xf32>
    %18 = vector.broadcast %17 : vector<1x128xf32> to vector<8x128xf32>
    %19 = arith.addf %16, %18 : vector<8x128xf32>
    %20 = arith.negf %19 : vector<8x128xf32>
    %21 = math.exp %20 : vector<8x128xf32>
    %cst_9 = arith.constant 1.000000e+00 : f32
    %22 = vector.broadcast %cst_9 : f32 to vector<8x128xf32>
    %23 = arith.addf %22, %21 : vector<8x128xf32>
    %24 = arith.divf %22, %23 : vector<8x128xf32>
    %25 = arith.mulf %19, %24 : vector<8x128xf32>
    %26 = arith.truncf %25 : vector<8x128xf32> to vector<8x128xbf16>
    %c0_10 = arith.constant 0 : index
    %c0_11 = arith.constant 0 : index
    %27 = vector.load %arg5[%c0_10, %c0_11] : memref<128x128xbf16, #tpu.memory_space<vmem>>, vector<128x128xbf16>
    %cst_12 = arith.constant dense<0.000000e+00> : vector<8x128xf32>
    %28 = tpu.matmul %26, %27, %cst_12 {dimension_numbers = #tpu.dot_dimension_numbers<[1], [0], [0], [1], [0, 0, 1, 1], [], []>} : vector<8x128xbf16>, vector<128x128xbf16>, vector<8x128xf32> -> vector<8x128xf32>
    %c0_13 = arith.constant 0 : index
    %c0_14 = arith.constant 0 : index
    %29 = vector.load %arg6[%c0_13, %c0_14] : memref<1x128xf32, #tpu.memory_space<vmem>>, vector<1x128xf32>
    %30 = vector.broadcast %29 : vector<1x128xf32> to vector<8x128xf32>
    %31 = arith.addf %28, %30 : vector<8x128xf32>
    %c0_15 = arith.constant 0 : index
    %c0_16 = arith.constant 0 : index
    %32 = vector.load %arg7[%c0_15, %c0_16] : memref<8x128xf32, #tpu.memory_space<vmem>>, vector<8x128xf32>
    tpu.vector_store %arg7[%c0_15, %c0_16], %31 {strides = array<i32>} : memref<8x128xf32, #tpu.memory_space<vmem>>, vector<8x128xf32>,
    return
  }
  func.func @transform_0(%arg0: i32) -> (i32, i32) {
    %c0_i32 = arith.constant 0 : i32
    %c0_i32_0 = arith.constant 0 : i32
    return %arg0, %c0_i32 : i32, i32
  }
  func.func @transform_1(%arg0: i32) -> (i32, i32) {
    %c0_i32 = arith.constant 0 : i32
    %c0_i32_0 = arith.constant 0 : i32
    %c0_i32_1 = arith.constant 0 : i32
    return %c0_i32, %c0_i32_0 : i32, i32
  }
  func.func @transform_2(%arg0: i32) -> (i32, i32) {
    %c0_i32 = arith.constant 0 : i32
    %c0_i32_0 = arith.constant 0 : i32
    %c0_i32_1 = arith.constant 0 : i32
    return %c0_i32, %c0_i32_0 : i32, i32
  }
  func.func @transform_3(%arg0: i32) -> (i32, i32) {
    %c0_i32 = arith.constant 0 : i32
    %c0_i32_0 = arith.constant 0 : i32
    %c0_i32_1 = arith.constant 0 : i32
    return %c0_i32, %c0_i32_0 : i32, i32
  }
  func.func @transform_4(%arg0: i32) -> (i32, i32) {
    %c0_i32 = arith.constant 0 : i32
    %c0_i32_0 = arith.constant 0 : i32
    %c0_i32_1 = arith.constant 0 : i32
    return %c0_i32, %c0_i32_0 : i32, i32
  }
  func.func @transform_5(%arg0: i32) -> (i32, i32) {
    %c0_i32 = arith.constant 0 : i32
    %c0_i32_0 = arith.constant 0 : i32
    %c0_i32_1 = arith.constant 0 : i32
    return %c0_i32, %c0_i32_0 : i32, i32
  }
  func.func @transform_6(%arg0: i32) -> (i32, i32) {
    %c0_i32 = arith.constant 0 : i32
    %c0_i32_0 = arith.constant 0 : i32
    return %arg0, %c0_i32 : i32, i32
  }
}

</mosaic_0001>

<bundles_post_ra>
// kernel: _timestep_embedder_jit.1
= control target key start
LH: loop header
LB: loop body
LE: loop exit
PB: predicated region body
PF: predicated region fallthrough
CT: control target
= control target key end

     0   :  { %11 = vsyncpa [#allocation3], 0  ;;  %s1084_s0 = inlined_call_operand.vmem [shape: f32[8,1], index: 0, kind: input, shape index: {}]   ;;  %s1085_s1 = inlined_call_operand.hbm [shape: bf16[128,128], index: 1, kind: input, shape index: {}]   ;;  %s1086_s2 = inlined_call_operand.hbm [shape: bf16[128,128], index: 2, kind: input, shape index: {}]   ;;  %s1087_s3 = inlined_call_operand.vmem [shape: f32[1,128], index: 3, kind: input, shape index: {}]   ;;  %s1088_s4 = inlined_call_operand.hbm [shape: bf16[128,128], index: 4, kind: input, shape index: {}]   ;;  %s1089_s5 = inlined_call_operand.vmem [shape: f32[1,128], index: 5, kind: input, shape index: {}]   ;;  %s1090_s6 = inlined_call_operand.hbm [shape: f32[8,128], index: 6, kind: output, shape index: {}]  }
   0x1   :  { %12 = vsyncpa [#allocation6], 0 }
   0x2   :  { %13 = vsyncpa [#allocation4], 0  ;;  %s910_s21 = smov [#allocation5]   ;;  %s911_s23 = smov [#allocation2]  }
   0x3   :  { %s33_s22 = sshll.u32 %s910_s21, 4  ;;  %s21_s24 = sshll.u32 %s911_s23, 4  ;;  %s34_s22 = int_to_ptr.vmem [resolvable:$true] %s33_s22  ;;  %s960_s24 = int_to_ptr.vmem [resolvable:$true] %s21_s24 }
   0x4   :  { %s816_s27 = scalar_lea.hbm %s1086_s2, 1024 }
   0x5   :  { %p817_p0 = scmp.ne.s32.totalorder %s1086_s2, %s816_s27  ;;  %p820_p1 = scmp.lt.u32.totalorder %s816_s27, %s1086_s2 }
   0x7   :  { %p822_p2 = pnand %p820_p1, %p817_p0 }
   0x9   :  { %825 = shalt.err (!%p822_p2)
}
   0xa   :  { %s826_s8 = scalar_lea.vmem %s34_s22, 1024  ;;  %p831_p4 = scmp.lt.s32.totalorder %s34_s22, %s34_s22 }
   0xb   :  { %p827_p3 = scmp.ne.s32.totalorder %s34_s22, %s826_s8  ;;  %p832_p5 = scmp.lt.s32.totalorder %s826_s8, %s826_s8 }
   0xd   :  { %p833_p6 = por %p832_p5, %p831_p4 }
   0xf   :  { %p834_p7 = pnand %p833_p6, %p827_p3 }
  0x11   :  { %837 = shalt.err (!%p834_p7)
}
  0x12   :  { %s912_s9 = smov 64   ;;  %s913_s10 = smov 4  }
  0x13   :  { %39 = dma.hbm_to_vmem [thread:$0]  %s1086_s2, 1024, %s34_s22, [#allocation6], %s912_s9, %s912_s9, %s913_s10  }
  0x14   :  { %s838_s15 = scalar_lea.hbm %s1085_s1, 1024 }
  0x15   :  { %p839_p8 = scmp.ne.s32.totalorder %s1085_s1, %s838_s15  ;;  %p842_p9 = scmp.lt.u32.totalorder %s838_s15, %s1085_s1 }
  0x17   :  { %p844_p10 = pnand %p842_p9, %p839_p8 }
  0x19   :  { %847 = shalt.err (!%p844_p10)
}
  0x1a   :  { %s848_s20 = scalar_lea.vmem %s960_s24, 1024  ;;  %p853_p12 = scmp.lt.s32.totalorder %s960_s24, %s960_s24 }
  0x1b   :  { %p849_p11 = scmp.ne.s32.totalorder %s960_s24, %s848_s20  ;;  %p854_p13 = scmp.lt.s32.totalorder %s848_s20, %s848_s20 }
  0x1d   :  { %p855_p0 = por %p854_p13, %p853_p12 }
  0x1f   :  { %p856_p1 = pnand %p855_p0, %p849_p11 }
  0x21   :  { %859 = shalt.err (!%p856_p1)
}
  0x22   :  { %27 = dma.hbm_to_vmem [thread:$0]  %s1085_s1, 1024, %s960_s24, [#allocation3], %s912_s9, %s912_s9, %s913_s10  }
  0x23   :  { %s914_s22 = smov [#allocation7]   ;;  %s860_s27 = scalar_lea.hbm %s1088_s4, 1024 }
  0x24   :  { %s47_s23 = sshll.u32 %s914_s22, 4  ;;  %p861_p2 = scmp.ne.s32.totalorder %s1088_s4, %s860_s27  ;;  %s48_s23 = int_to_ptr.vmem [resolvable:$true] %s47_s23 }
  0x25   :  { %p864_p3 = scmp.lt.u32.totalorder %s860_s27, %s1088_s4 }
  0x27   :  { %p866_p4 = pnand %p864_p3, %p861_p2 }
  0x29   :  { %869 = shalt.err (!%p866_p4)
}
  0x2a   :  { %s870_s8 = scalar_lea.vmem %s48_s23, 1024  ;;  %p875_p6 = scmp.lt.s32.totalorder %s48_s23, %s48_s23 }
  0x2b   :  { %p871_p5 = scmp.ne.s32.totalorder %s48_s23, %s870_s8  ;;  %p876_p7 = scmp.lt.s32.totalorder %s870_s8, %s870_s8 }
  0x2d   :  { %p877_p8 = por %p876_p7, %p875_p6 }
  0x2f   :  { %p878_p9 = pnand %p877_p8, %p871_p5 }
  0x31   :  { %881 = shalt.err (!%p878_p9)
}
  0x32   :  { %53 = dma.hbm_to_vmem [thread:$0]  %s1088_s4, 1024, %s48_s23, [#allocation6], %s912_s9, %s912_s9, %s913_s10  }
  0x33   :  { %904 = dma.done.wait [#allocation3], 1024  }
  0x34   :  { %905 = vsyncadd [#allocation3], 4294966272 }
  0x35   :  { %906 = dma.done.wait [#allocation6], 2048  }
  0x36   :  { %907 = vsyncadd [#allocation6], 4294965248  ;;  %v915_v0 = vmov 0   ;;  %v66_v1 = vld [vmem:[%s1084_s0] sm:$0xff]  ;;  %v916_v4 = vmov 0.0   ;;  %v784_v5 = vld [vmem:[#allocation5 + $0x8] sm:$0xff]   ;;  %v67_v19 = vlaneseq }
  0x37   :  { %781 = vset.pattern.permute.xlu0 %v915_v0  ;;  %v782_v2 = vld [vmem:[#allocation5] sm:$0xff]   ;;  %702 = vmatprep.subr.bf16.mxu0 %v916_v4  ;;  %v785_v6 = vld [vmem:[#allocation2 + $0x8] sm:$0xff]   ;;  %v786_v7 = vld [vmem:[#allocation5 + $0x10] sm:$0xff]   ;;  %vm917_vm0 = vmmov 0   ;;  %v918_v37 = vmov 683565275  }
  0x38   :  { %75 = vperm.xlu0 %781, %v66_v1   ;;  %v783_v3 = vld [vmem:[#allocation2] sm:$0xff]   ;;  %722 = vmatprep.subr.bf16.mxu1 %v916_v4  ;;  %v787_v8 = vld [vmem:[#allocation2 + $0x10] sm:$0xff]   ;;  %v788_v9 = vld [vmem:[#allocation5 + $0x18] sm:$0xff]   ;;  %v68_v20 = vand.u32 127, %v67_v19  ;;  %v919_v39 = vmov 2475754826  }
  0x39   :  { %703 = vmatpush3.bf16.msra.mxu0 %v782_v2  ;;  %723 = vmatpush3.bf16.msra.mxu1 %v783_v3  ;;  %v789_v10 = vld [vmem:[#allocation2 + $0x18] sm:$0xff]   ;;  %v790_v11 = vld [vmem:[#allocation5 + $0x20] sm:$0xff]   ;;  %v792_v13 = vld [vmem:[#allocation5 + $0x28] sm:$0xff]   ;;  %v920_v42 = vmov 2131351028  }
  0x3a   :  { %704 = vmatprep.subr.bf16.mxu0 %v916_v4  ;;  %724 = vmatprep.subr.bf16.mxu1 %v916_v4  ;;  %v791_v12 = vld [vmem:[#allocation2 + $0x20] sm:$0xff]   ;;  %v793_v14 = vld [vmem:[#allocation2 + $0x28] sm:$0xff]   ;;  %v794_v15 = vld [vmem:[#allocation5 + $0x30] sm:$0xff]   ;;  %v69_v21 = vcvt.s32.f32 %v68_v20  ;;  %v921_v45 = vmov 2102212464  }
  0x3b   :  { %718 = vmatprep.mubr.msk.bf16.mxu0 %vm917_vm0, %v916_v4  ;;  %738 = vmatprep.mubr.msk.bf16.mxu1 %vm917_vm0, %v916_v4  ;;  %v795_v16 = vld [vmem:[#allocation2 + $0x30] sm:$0xff]   ;;  %v796_v17 = vld [vmem:[#allocation5 + $0x38] sm:$0xff]   ;;  %v922_v48 = vmov 920167782   ;;  %v923_v51 = vmov 1326507024  }
  0x3c   :  { %v797_v18 = vld [vmem:[#allocation2 + $0x38] sm:$0xff]   ;;  %v70_v22 = vmul.f32 -0.071955785, %v69_v21 }
  0x3d   :  { %705 = vmatpush3.bf16.msra.mxu0 %v784_v5  ;;  %725 = vmatpush3.bf16.msra.mxu1 %v785_v6 }
  0x3e   :  { %706 = vmatprep.subr.bf16.mxu0 %v916_v4  ;;  %726 = vmatprep.subr.bf16.mxu1 %v916_v4  ;;  %v71_v23 = vmul.f32 1.442695, %v70_v22 }
  0x40   :  { %806 = vpow2.f32 %v71_v23 }
  0x41   :  { %707 = vmatpush3.bf16.msra.mxu0 %v786_v7  ;;  %727 = vmatpush3.bf16.msra.mxu1 %v787_v8 }
  0x42   :  { %708 = vmatprep.subr.bf16.mxu0 %v916_v4  ;;  %728 = vmatprep.subr.bf16.mxu1 %v916_v4 }
  0x45   :  { %709 = vmatpush3.bf16.msra.mxu0 %v788_v9  ;;  %729 = vmatpush3.bf16.msra.mxu1 %v789_v10 }
  0x46   :  { %710 = vmatprep.subr.bf16.mxu0 %v916_v4  ;;  %730 = vmatprep.subr.bf16.mxu1 %v916_v4 }
  0x49   :  { %711 = vmatpush3.bf16.msra.mxu0 %v790_v11  ;;  %731 = vmatpush3.bf16.msra.mxu1 %v791_v12 }
  0x4a   :  { %712 = vmatprep.subr.bf16.mxu0 %v916_v4  ;;  %732 = vmatprep.subr.bf16.mxu1 %v916_v4  ;;  %v807_v24 = vpop.eup %806 }
  0x4d   :  { %713 = vmatpush3.bf16.msra.mxu0 %v792_v13  ;;  %733 = vmatpush3.bf16.msra.mxu1 %v793_v14 }
  0x4e   :  { %714 = vmatprep.subr.bf16.mxu0 %v916_v4  ;;  %734 = vmatprep.subr.bf16.mxu1 %v916_v4 }
  0x51   :  { %715 = vmatpush3.bf16.msra.mxu0 %v794_v15  ;;  %735 = vmatpush3.bf16.msra.mxu1 %v795_v16 }
  0x52   :  { %716 = vmatprep.subr.bf16.mxu0 %v916_v4  ;;  %736 = vmatprep.subr.bf16.mxu1 %v916_v4 }
  0x55   :  { %717 = vmatpush3.bf16.msra.mxu0 %v796_v17  ;;  %737 = vmatpush3.bf16.msra.mxu1 %v797_v18 }
  0x56   :  { %742 = vmatprep.subr.bf16.mxu0 %v916_v4 }
  0xb7   :  { %v76_v25 = vpop.permute.xlu0 %75 }
  0xb8   :  { %v1036_v26 = vmul.f32 %v807_v24, %v76_v25 }
  0xba   :  { %v82_v27 = vand.u32 2139095040, %v1036_v26  ;;  %v79_v31 = vand.u32 2147483647, %v1036_v26  ;;  %vm81_vm8 = vcmp.lt.s32.totalorder %v1036_v26, 0 }
  0xbc   :  { %v83_v28 = vshrl.u32 %v82_v27, 23  ;;  %v86_v34 = vand.u32 8388607, %v79_v31  ;;  %vm80_vm9 = vcmp.le.f32.partialorder %v79_v31, 0.7853982 }
  0xbe   :  { %v640_v29 = vadd.s32 4294967169, %v83_v28  ;;  %v87_v53 = vor.u32 8388608, %v86_v34 }
  0xc0   :  { %v89_v30 = vadd.s32 1, %v640_v29  ;;  %v127_v3 = vshll.u32 %v87_v53, 8 }
  0xc2   :  { %vm90_vm1 = vcmp.gt.s32.totalorder %v89_v30, 0 }
  0xc3   :  { %v91_v32 = vsel %vm90_vm1, %v89_v30, 0  ;;  %vm171_vm1 = vweird.f32 %v1036_v26 }
  0xc4   :  { %v93_v33 = vand.u32 31, %v91_v32  ;;  %v92_v36 = vshrl.u32 %v91_v32, 5 }
  0xc6   :  { %v94_v35 = vsub.s32 32, %v93_v33  ;;  %v96_v38 = vshll.u32 %v918_v37, %v93_v33  ;;  %v99_v40 = vshll.u32 %v919_v39, %v93_v33  ;;  %v102_v44 = vshll.u32 %v920_v42, %v93_v33 }
  0xc7   :  { %v105_v47 = vshll.u32 %v921_v45, %v93_v33  ;;  %v108_v50 = vshll.u32 %v922_v48, %v93_v33  ;;  %vm111_vm2 = vcmp.lt.s32.totalorder %v92_v36, 1  ;;  %vm114_vm3 = vcmp.lt.s32.totalorder %v92_v36, 4 }
  0xc8   :  { %v97_v41 = vshrl.u32 %v919_v39, %v94_v35  ;;  %v100_v43 = vshrl.u32 %v920_v42, %v94_v35  ;;  %v103_v46 = vshrl.u32 %v921_v45, %v94_v35  ;;  %v106_v49 = vshrl.u32 %v922_v48, %v94_v35 }
  0xc9   :  { %v109_v52 = vshrl.u32 %v923_v51, %v94_v35  ;;  %v95_v62 = vshrl.u32 %v918_v37, %v94_v35  ;;  %vm113_vm4 = vcmp.lt.s32.totalorder %v92_v36, 3  ;;  %vm112_vm5 = vcmp.lt.s32.totalorder %v92_v36, 2 }
  0xca   :  { %v98_v54 = vor.u32 %v97_v41, %v96_v38  ;;  %v101_v55 = vor.u32 %v100_v43, %v99_v40  ;;  %v104_v56 = vor.u32 %v103_v46, %v102_v44  ;;  %v107_v57 = vor.u32 %v106_v49, %v105_v47 }
  0xcb   :  { %v110_v58 = vor.u32 %v109_v52, %v108_v50 }
  0xcc   :  { %v116_v59 = vsel %vm114_vm3, %v104_v56, 2102212464  ;;  %v119_v60 = vsel %vm111_vm2, %v98_v54, %v101_v55  ;;  %v123_v61 = vsel %vm111_vm2, %v101_v55, %v104_v56  ;;  %v120_v63 = vsel %vm114_vm3, %v107_v57, 920167782 }
  0xcd   :  { %v124_v0 = vsel %vm114_vm3, %v110_v58, 1326507024  ;;  %v121_v1 = vsel %vm113_vm4, %v104_v56, %v120_v63  ;;  %v115_v5 = vsel %vm111_vm2, %v95_v62, %v98_v54  ;;  %v117_v6 = vsel %vm113_vm4, %v101_v55, %v116_v59  ;;  %v798_v63 = vld [vmem:[#allocation7] sm:$0xff]  }
  0xce   :  { %v125_v2 = vsel %vm113_vm4, %v107_v57, %v124_v0  ;;  %v122_v7 = vsel %vm112_vm5, %v119_v60, %v121_v1  ;;  %v118_v13 = vsel %vm112_vm5, %v115_v5, %v117_v6  ;;  %v799_v0 = vld [vmem:[#allocation7 + $0x8] sm:$0xff]   ;;  %v801_v1 = vld [vmem:[#allocation7 + $0x18] sm:$0xff]   ;;  %v804_v5 = vld [vmem:[#allocation7 + $0x30] sm:$0xff]  }
  0xcf   :  { %v126_v8 = vsel %vm112_vm5, %v123_v61, %v125_v2  ;;  %v1045_v11 = vmul.u32.u64.low %v127_v3, %v122_v7  ;;  %v1046_v12 = vmul.u32.u64.high %v127_v3, %v122_v7, %v1045_v11  ;;  %v134_v15 = vmul.u32 %v127_v3, %v118_v13  ;;  %v802_v2 = vld [vmem:[#allocation7 + $0x20] sm:$0xff]   ;;  %v805_v6 = vld [vmem:[#allocation7 + $0x38] sm:$0xff]  }
  0xd0   :  { %v1042_v9 = vmul.u32.u64.low %v127_v3, %v126_v8  ;;  %v1043_v10 = vmul.u32.u64.high %v127_v3, %v126_v8, %v1042_v9  ;;  %v803_v3 = vld [vmem:[#allocation7 + $0x28] sm:$0xff]  }
  0xd1   :  { %v137_v14 = vadd.s32 1, %v1046_v12  ;;  %v664_v9 = vld [vmem:[%s1087_s3] ss:$0 sm:$0xff]  ;;  %s924_s3 = smov [#allocation8]  }
  0xd2   :  { %vm136_vm6 = vc.u32 %v1043_v10, %v1045_v11  ;;  %v135_v28 = vadd.s32 %v1045_v11, %v1043_v10  ;;  %s630_s13 = sshll.u32 %s924_s3, 4  ;;  %s631_s13 = int_to_ptr.vmem [resolvable:$true] %s630_s13 }
  0xd3   :  { %v138_v16 = vsel %vm136_vm6, %v137_v14, %v1046_v12  ;;  %s882_s14 = scalar_lea.vmem %s631_s13, 128  ;;  %p887_p11 = scmp.lt.s32.totalorder %s631_s13, %s631_s13 }
  0xd4   :  { %v139_v17 = vadd.s32 %v138_v16, %v134_v15  ;;  %p883_p10 = scmp.ne.s32.totalorder %s631_s13, %s882_s14  ;;  %p888_p12 = scmp.lt.s32.totalorder %s882_s14, %s882_s14 }
  0xd6   :  { %v140_v18 = vadd.s32 536870912, %v139_v17  ;;  %p889_p13 = por %p888_p12, %p887_p11 }
  0xd8   :  { %v141_v19 = vshrl.u32 %v140_v18, 30  ;;  %p890_p0 = pnand %p889_p13, %p883_p10 }
  0xda   :  { %v142_v20 = vshll.u32 %v141_v19, 30  ;;  %v165_v41 = vsub.s32 4, %v141_v19 }
  0xdc   :  { %v143_v21 = vsub.s32 %v139_v17, %v142_v20  ;;  %v166_v44 = vsel %vm81_vm8, %v165_v41, %v141_v19 }
  0xdd   :  { %v168_v46 = vsel %vm80_vm9, 0, %v166_v44 }
  0xde   :  { %v145_v22 = vsub.s32 0, %v143_v21  ;;  %v276_v47 = vadd.s32 3, %v168_v46  ;;  %v172_v49 = vand.u32 3, %v168_v46 }
  0xe0   :  { %v641_v23 = vmin.u32 %v145_v22, %v143_v21  ;;  %v277_v48 = vand.u32 3, %v276_v47  ;;  %vm177_vm11 = vcmp.eq.s32.totalorder %v172_v49, 2  ;;  %vm174_vm13 = vcmp.eq.s32.totalorder %v172_v49, 0 }
  0xe1   :  { %vm173_vm15 = vcmp.lt.s32.totalorder %v172_v49, 2 }
  0xe2   :  { %v147_v24 = vclz %v641_v23  ;;  %vm282_vm10 = vcmp.eq.s32.totalorder %v277_v48, 2  ;;  %vm279_vm12 = vcmp.eq.s32.totalorder %v277_v48, 0  ;;  %vm278_vm14 = vcmp.lt.s32.totalorder %v277_v48, 2  ;;  %v666_v23 = vld [vmem:[%s1089_s5] ss:$0 sm:$0xff] }
  0xe4   :  { %v642_v25 = vadd.s32 4294967294, %v147_v24 }
  0xe6   :  { %vm643_vm7 = vcmp.lt.s32.totalorder %v642_v25, 0 }
  0xe7   :  { %v150_v27 = vsel %vm643_vm7, 0, %v642_v25 }
  0xe8   :  { %v151_v29 = vsub.s32 32, %v150_v27  ;;  %v155_v30 = vsub.s32 4294967266, %v150_v27  ;;  %v152_v32 = vshll.u32 %v143_v21, %v150_v27 }
  0xea   :  { %v153_v33 = vshrl.u32 %v135_v28, %v151_v29  ;;  %v156_v34 = vadd.s32 127, %v155_v30 }
  0xec   :  { %v154_v35 = vor.u32 %v153_v33, %v152_v32  ;;  %v157_v36 = vshll.u32 %v156_v34, 23 }
  0xee   :  { %v158_v37 = vor.u32 4788187, %v157_v36  ;;  %v161_v39 = vcvt.s32.f32 %v154_v35 }
  0xf0   :  { %v159_v38 = vand.u32 2147483647, %v158_v37 }
  0xf2   :  { %v162_v40 = vmul.f32 %v161_v39, %v159_v38 }
  0xf4   :  { %v163_v42 = vxor.u32 2147483648, %v162_v40 }
  0xf6   :  { %v164_v43 = vsel %vm81_vm8, %v163_v42, %v162_v40 }
  0xf7   :  { %v167_v45 = vsel %vm80_vm9, %v1036_v26, %v164_v43  ;;  %v800_v26 = vld [vmem:[#allocation7 + $0x10] sm:$0xff]  }
  0xf8   :  { %808 = vcosq.f32 %v167_v45 }
  0xf9   :  { %810 = vsinq.f32 %v167_v45 }
 0x102   :  { %v809_v50 = vpop.eup %808 }
 0x103   :  { %v811_v51 = vpop.eup %810  ;;  %v178_v52 = vxor.u32 2147483648, %v809_v50 }
 0x104   :  { %v175_v53 = vxor.u32 2147483648, %v811_v51 }
 0x105   :  { %v284_v54 = vsel %vm282_vm10, %v178_v52, %v811_v51  ;;  %v179_v31 = vsel %vm177_vm11, %v178_v52, %v811_v51 }
 0x106   :  { %v281_v55 = vsel %vm279_vm12, %v809_v50, %v175_v53  ;;  %v176_v56 = vsel %vm174_vm13, %v809_v50, %v175_v53 }
 0x107   :  { %v285_v57 = vsel %vm278_vm14, %v281_v55, %v284_v54  ;;  %v180_v58 = vsel %vm173_vm15, %v176_v56, %v179_v31 }
 0x108   :  { %v286_v59 = vsel %vm171_vm1, nan, %v285_v57  ;;  %v181_v60 = vsel %vm171_vm1, nan, %v180_v58 }
 0x109   :  { %v287_v61 = vpack.c.bf16 %v286_v59, %v286_v59  ;;  %v182_v62 = vpack.c.bf16 %v181_v60, %v181_v60 }
 0x10b   :  { %719 = vmatmul.mubr.bf16.vlgmr.msra.gmra.mrb[0].mxu0 %v287_v61  ;;  %739 = vmatmul.mubr.bf16.vlgmr.msra.gmra.mrb[0].mxu1 %v182_v62 }
 0x10c   :  { %758 = vmatprep.mubr.msk.bf16.mxu0 %vm917_vm0, %v916_v4  ;;  %743 = vmatpush3.bf16.msra.mxu0 %v798_v63 }
 0x10d   :  { %744 = vmatprep.subr.bf16.mxu0 %v916_v4 }
 0x110   :  { %745 = vmatpush3.bf16.msra.mxu0 %v799_v0 }
 0x111   :  { %746 = vmatprep.subr.bf16.mxu0 %v916_v4 }
 0x114   :  { %747 = vmatpush3.bf16.msra.mxu0 %v800_v26 }
 0x115   :  { %748 = vmatprep.subr.bf16.mxu0 %v916_v4 }
 0x118   :  { %749 = vmatpush3.bf16.msra.mxu0 %v801_v1 }
 0x119   :  { %750 = vmatprep.subr.bf16.mxu0 %v916_v4 }
 0x11c   :  { %751 = vmatpush3.bf16.msra.mxu0 %v802_v2 }
 0x11d   :  { %752 = vmatprep.subr.bf16.mxu0 %v916_v4 }
 0x120   :  { %753 = vmatpush3.bf16.msra.mxu0 %v803_v3 }
 0x121   :  { %754 = vmatprep.subr.bf16.mxu0 %v916_v4 }
 0x124   :  { %755 = vmatpush3.bf16.msra.mxu0 %v804_v5 }
 0x125   :  { %756 = vmatprep.subr.bf16.mxu0 %v916_v4 }
 0x128   :  { %757 = vmatpush3.bf16.msra.mxu0 %v805_v6 }
 0x1de   :  { %v402_v7 = vpop.f32.mrb[0].mxu0  ;;  %v490_v8 = vpop.f32.mrb[0].mxu1 }
 0x1df   :  { %v491_v10 = vadd.f32 %v490_v8, %v402_v7  ;;  %v720_v11 = vpop.f32.mrb[1].mxu0  ;;  %v740_v12 = vpop.f32.mrb[1].mxu1 }
 0x1e0   :  { %v405_v13 = vpop.f32.mrb[2].mxu0  ;;  %v493_v14 = vpop.f32.mrb[2].mxu1 }
 0x1e1   :  { %v503_v15 = vadd.f32 %v664_v9, %v491_v10  ;;  %v721_v16 = vpop.f32.mrb[3].mxu0  ;;  %v741_v17 = vpop.f32.mrb[3].mxu1 }
 0x1e3   :  { %v665_v18 = vmul.f32 -1.442695, %v503_v15 }
 0x1e5   :  { %812 = vpow2.f32 %v665_v18 }
 0x1ef   :  { %v813_v19 = vpop.eup %812 }
 0x1f0   :  { %v507_v4 = vadd.f32 1.0, %v813_v19 }
 0x1f2   :  { %814 = vrcp.f32 %v507_v4 }
 0x1fc   :  { %v815_v20 = vpop.eup %814 }
 0x1fd   :  { %v510_v21 = vmul.f32 %v815_v20, %v503_v15 }
 0x1ff   :  { %v511_v22 = vpack.c.bf16 %v510_v21, %v510_v21 }
 0x201   :  { %759 = vmatmul.mubr.bf16.vlgmr.msra.gmra.mrb[4].mxu0 %v511_v22 }
 0x2d4   :  { %v617_v24 = vpop.f32.mrb[4].mxu0 }
 0x2d5   :  { %v618_v25 = vadd.f32 %v666_v23, %v617_v24  ;;  %v760_v27 = vpop.f32.mrb[5].mxu0 }
 0x2d6   :  { %v620_v28 = vpop.f32.mrb[6].mxu0 }
 0x2d7   :  { %623 = vst [vmem:[#allocation8] sm:$0xff] %v618_v25  ;;  %v761_v29 = vpop.f32.mrb[7].mxu0 }
 0x2d8   :  { %893 = shalt.err (!%p890_p0)
}
 0x2d9   :  { %s894_s5 = scalar_lea.hbm %s1090_s6, 128 }
 0x2da   :  { %p895_p1 = scmp.ne.s32.totalorder %s1090_s6, %s894_s5  ;;  %p898_p2 = scmp.lt.u32.totalorder %s894_s5, %s1090_s6 }
 0x2dc   :  { %p900_p3 = pnand %p898_p2, %p895_p1 }
 0x2de   :  { %903 = shalt.err (!%p900_p3)
}
 0x2df   :  { %633 = dma.vmem_to_hbm [thread:$0]  %s631_s13, 128, %s1090_s6, [#allocation4]  }
 0x2e0   :  { %908 = dma.done.wait [#allocation4], 128  }
 0x2e1   :  { %909 = vsyncadd [#allocation4], 4294967168 }
 0x2e2   :  { %637 = vsyncpa [#allocation3], 1 }
 0x2e3   :  { %638 = vsyncpa [#allocation6], 1 }
 0x2e4   :  { %639 = vsyncpa [#allocation4], 1 }

</bundles_post_ra>
